<compile_context>
chip_gen: v7x
topology: tpu7x:2x2x1
jax: 0.10.0
libtpu: 0.0.40
codegen_flags: <defaults>
</compile_context>

<pallas_src>
import functools
import math

import jax
import jax.numpy as jnp
from jax.experimental import pallas as pl
from jax.experimental.pallas import tpu as pltpu

LANE = 128
SUBLANE = 8
ROW_ALIGN = 16           # bf16-friendly sublane packing for the target stream
MAX_BLOCK_ROWS = 1024    # 1024*128*4B = 512 KiB per f32 input block


def _round_up(x, m):
    return ((x + m - 1) // m) * m


def _int_pow(v, p):
    """v**p for small positive integer p via repeated multiplies (VPU only)."""
    acc = None
    base = v
    while p:
        if p & 1:
            acc = base if acc is None else acc * base
        p >>= 1
        if p:
            base = base * base
    return acc


def _partials_kernel(gamma, x_ref, t_ref, o_ref):
    """One grid step over a (BLOCK_ROWS, 128) tile.

    Writes (1, 4, 8, 128) vreg-shaped partial sums:
      o[0,0] = sum sigmoid(x)*t     (dice intersection)
      o[0,1] = sum sigmoid(x)
      o[0,2] = sum t
      o[0,3] = sum focal_elem(x, t)
    """
    x = x_ref[...].astype(jnp.float32)
    t = t_ref[...].astype(jnp.float32)

    # --- dice pieces -------------------------------------------------------
    s = 0.5 * (jnp.tanh(0.5 * x) + 1.0)          # sigmoid(x), single EUP op

    # --- focal pieces (elementwise part of FocalLoss) ----------------------
    # bce  = x - x*t + max(-x,0) + log(exp(-max(-x,0)) + exp(-x - max(-x,0)))
    #      = x - x*t + softplus(-x)                       (exact identity)
    # weight = exp(gamma * logsigmoid(-x*(2t-1))) = sigmoid(-z)^gamma,
    #          z = x*(2t-1)
    softplus_negx = jnp.maximum(-x, 0.0) + jnp.log(1.0 + jnp.exp(-jnp.abs(x)))
    bce = x - x * t + softplus_negx

    z = x * (t * 2.0 - 1.0)
    sig_negz = 0.5 * (1.0 - jnp.tanh(0.5 * z))   # sigmoid(-z), single EUP op
    g = float(gamma)
    if g.is_integer() and 1 <= int(g) <= 8:
        weight = _int_pow(sig_negz, int(g))      # VPU-only power (default g=2)
    else:
        weight = jnp.exp(g * jnp.log(sig_negz))  # generic path (2 EUP ops)
    focal = weight * bce

    def vreg_partial(v):
        # (BLOCK_ROWS, 128) -> (BLOCK_ROWS//8, 8, 128); reshape follows vreg
        # boundaries, sum(axis=0) is a tree of plain vadds (no XLU reduce).
        return jnp.sum(v.reshape(-1, SUBLANE, LANE), axis=0)

    o_ref[0, 0, :, :] = vreg_partial(s * t)
    o_ref[0, 1, :, :] = vreg_partial(s)
    o_ref[0, 2, :, :] = vreg_partial(t)
    o_ref[0, 3, :, :] = vreg_partial(focal)


def mixed_loss_pallas(x, target, alpha=10.0, gamma=2.0):
    """MixedLoss.forward(x, target): alpha * focal - log(dice). Scalar f32."""
    n = x.size
    xf = x.reshape(-1).astype(jnp.float32)
    tf = target.reshape(-1)            # keep caller dtype (bf16 halves HBM bytes)

    rows = pl.cdiv(n, LANE)
    block_rows = min(MAX_BLOCK_ROWS, _round_up(rows, ROW_ALIGN))
    total_rows = _round_up(rows, block_rows)
    pad = total_rows * LANE - n
    if pad:
        # TODO(synk): for huge inputs with a ragged tail this pad is one extra
        # HBM pass; a separate tail-correction pass could avoid it.
        xf = jnp.pad(xf, (0, pad))
        tf = jnp.pad(tf, (0, pad))
    x2 = xf.reshape(total_rows, LANE)
    t2 = tf.reshape(total_rows, LANE)

    num_blocks = total_rows // block_rows
    blk = pl.BlockSpec((block_rows, LANE), lambda i: (i, 0))

    partials = pl.pallas_call(
        functools.partial(_partials_kernel, float(gamma)),
        out_shape=jax.ShapeDtypeStruct((num_blocks, 4, SUBLANE, LANE), jnp.float32),
        grid_spec=pltpu.PrefetchScalarGridSpec(
            num_scalar_prefetch=0,
            grid=(num_blocks,),
            in_specs=[blk, blk],
            out_specs=pl.BlockSpec((1, 4, SUBLANE, LANE),
                                   lambda i: (i, 0, 0, 0)),
        ),
        compiler_params=pltpu.CompilerParams(
            # No carried accumulator -> the single grid axis is fully parallel
            # (both TensorCores on v7x; harmless on single-TC v5e/v6e).
            dimension_semantics=("parallel",),
        ),
    )(x2, t2)

    sums = jnp.sum(partials, axis=(0, 2, 3))          # tiny (4,) XLA reduce
    inter, s_sum, t_sum, f_sum = sums[0], sums[1], sums[2], sums[3]

    if pad:
        # Padded elements are (x=0, t=0):
        #   sigmoid(0) = 0.5              -> remove 0.5 * pad from sum(sigmoid)
        #   focal(0,0) = 2^-gamma * ln(2) -> remove that * pad from focal sum
        # (t_sum and the intersection pick up exactly 0 from padding.)
        s_sum = s_sum - 0.5 * pad
        f_sum = f_sum - pad * (math.log(2.0) * (2.0 ** (-float(gamma))))

    smooth = 1.0
    focal = f_sum / n
    dice = (2.0 * inter + smooth) / (s_sum + t_sum + smooth)
    return alpha * focal - jnp.log(dice)


def mixed_loss_ref(x, target, alpha=10.0, gamma=2.0):
    """Pure-JAX mirror of the PyTorch MixedLoss.forward."""
    xf = x.astype(jnp.float32)
    tf = target.astype(jnp.float32)
    # FocalLoss
    max_val = jnp.maximum(-xf, 0.0)
    bce = xf - xf * tf + max_val + jnp.log(jnp.exp(-max_val) + jnp.exp(-xf - max_val))
    invprobs = jax.nn.log_sigmoid(-xf * (tf * 2.0 - 1.0))
    focal = jnp.mean(jnp.exp(invprobs * gamma) * bce)
    # DiceLoss
    s = jax.nn.sigmoid(xf).reshape(-1)
    t = tf.reshape(-1)
    smooth = 1.0
    dice = (2.0 * jnp.sum(s * t) + smooth) / (jnp.sum(s) + jnp.sum(t) + smooth)
    return alpha * focal - jnp.log(dice)


if __name__ == "__main__":
    key = jax.random.PRNGKey(0)
    k1, k2 = jax.random.split(key)
    # NCHW logits / binary segmentation mask, matching the PyTorch usage.
    x = jax.random.normal(k1, (2, 4, 16, 16), dtype=jnp.float32)
    # 0/1 mask is exact in bf16; halves that HBM stream for the kernel.
    target = (jax.random.uniform(k2, (2, 4, 16, 16)) > 0.5).astype(jnp.bfloat16)

    out = jax.block_until_ready(mixed_loss_pallas(x, target))
    ref = jax.block_until_ready(mixed_loss_ref(x, target))

    assert jnp.allclose(out, ref, rtol=1e-4, atol=1e-5), (out, ref)
    print("KERNEL_OK")
</pallas_src>

<mosaic_0001>
module attributes {stable_mosaic.version = 11 : i64} {
  func.func @_partials_kernel(%arg0: i32, %arg1: memref<16x128xf32, #tpu.memory_space<vmem>>, %arg2: memref<16x128xbf16, #tpu.memory_space<vmem>>, %arg3: memref<1x4x8x128xf32, #tpu.memory_space<vmem>>) attributes {dimension_semantics = [#tpu.dimension_semantics<parallel>], iteration_bounds = array<i64: 1>, scalar_prefetch = 0 : i64, scratch_operands = 0 : i64, tpu.core_type = #tpu.core_type<tc>, window_params = [{transform_indices = @transform_0, window_bounds = array<i64: 16, 128>}, {transform_indices = @transform_1, window_bounds = array<i64: 16, 128>}, {transform_indices = @transform_2, window_bounds = array<i64: 1, 4, 8, 128>}]} {
    %c0 = arith.constant 0 : index
    %c0_0 = arith.constant 0 : index
    %0 = vector.load %arg1[%c0, %c0_0] : memref<16x128xf32, #tpu.memory_space<vmem>>, vector<16x128xf32>
    %c0_1 = arith.constant 0 : index
    %c0_2 = arith.constant 0 : index
    %1 = vector.load %arg2[%c0_1, %c0_2] : memref<16x128xbf16, #tpu.memory_space<vmem>>, vector<16x128xbf16>
    %2 = arith.extf %1 : vector<16x128xbf16> to vector<16x128xf32>
    %cst = arith.constant 5.000000e-01 : f32
    %3 = vector.broadcast %cst : f32 to vector<16x128xf32>
    %4 = arith.mulf %3, %0 : vector<16x128xf32>
    %5 = math.tanh %4 : vector<16x128xf32>
    %cst_3 = arith.constant 1.000000e+00 : f32
    %6 = vector.broadcast %cst_3 : f32 to vector<16x128xf32>
    %7 = arith.addf %5, %6 : vector<16x128xf32>
    %cst_4 = arith.constant 5.000000e-01 : f32
    %8 = vector.broadcast %cst_4 : f32 to vector<16x128xf32>
    %9 = arith.mulf %8, %7 : vector<16x128xf32>
    %cst_5 = arith.constant 0.000000e+00 : f32
    %10 = vector.broadcast %cst_5 : f32 to vector<16x128xf32>
    %11 = arith.subf %10, %0 : vector<16x128xf32>
    %cst_6 = arith.constant 0.000000e+00 : f32
    %12 = vector.broadcast %cst_6 : f32 to vector<16x128xf32>
    %13 = arith.maximumf %11, %12 : vector<16x128xf32>
    %14 = math.absf %0 : vector<16x128xf32>
    %cst_7 = arith.constant 0.000000e+00 : f32
    %15 = vector.broadcast %cst_7 : f32 to vector<16x128xf32>
    %16 = arith.subf %15, %14 : vector<16x128xf32>
    %17 = math.exp %16 : vector<16x128xf32>
    %cst_8 = arith.constant 1.000000e+00 : f32
    %18 = vector.broadcast %cst_8 : f32 to vector<16x128xf32>
    %19 = arith.addf %18, %17 : vector<16x128xf32>
    %20 = math.log %19 : vector<16x128xf32>
    %21 = arith.addf %13, %20 : vector<16x128xf32>
    %22 = arith.mulf %0, %2 : vector<16x128xf32>
    %23 = arith.subf %0, %22 : vector<16x128xf32>
    %24 = arith.addf %23, %21 : vector<16x128xf32>
    %cst_9 = arith.constant 2.000000e+00 : f32
    %25 = vector.broadcast %cst_9 : f32 to vector<16x128xf32>
    %26 = arith.mulf %2, %25 : vector<16x128xf32>
    %cst_10 = arith.constant 1.000000e+00 : f32
    %27 = vector.broadcast %cst_10 : f32 to vector<16x128xf32>
    %28 = arith.subf %26, %27 : vector<16x128xf32>
    %29 = arith.mulf %0, %28 : vector<16x128xf32>
    %cst_11 = arith.constant 5.000000e-01 : f32
    %30 = vector.broadcast %cst_11 : f32 to vector<16x128xf32>
    %31 = arith.mulf %30, %29 : vector<16x128xf32>
    %32 = math.tanh %31 : vector<16x128xf32>
    %cst_12 = arith.constant 1.000000e+00 : f32
    %33 = vector.broadcast %cst_12 : f32 to vector<16x128xf32>
    %34 = arith.subf %33, %32 : vector<16x128xf32>
    %cst_13 = arith.constant 5.000000e-01 : f32
    %35 = vector.broadcast %cst_13 : f32 to vector<16x128xf32>
    %36 = arith.mulf %35, %34 : vector<16x128xf32>
    %37 = arith.mulf %36, %36 : vector<16x128xf32>
    %38 = arith.mulf %37, %24 : vector<16x128xf32>
    %39 = arith.mulf %9, %2 : vector<16x128xf32>
    %40 = vector.shape_cast %39 : vector<16x128xf32> to vector<2x8x128xf32>
    %cst_14 = arith.constant dense<0.000000e+00> : vector<8x128xf32>
    %41 = vector.multi_reduction <add>, %40, %cst_14 [0] : vector<2x8x128xf32> to vector<8x128xf32>
    %c0_15 = arith.constant 0 : index
    %c0_16 = arith.constant 0 : index
    %c0_17 = arith.constant 0 : index
    %c0_18 = arith.constant 0 : index
    %42 = vector.load %arg3[%c0_15, %c0_16, %c0_17, %c0_18] : memref<1x4x8x128xf32, #tpu.memory_space<vmem>>, vector<1x1x8x128xf32>
    %43 = vector.shape_cast %42 : vector<1x1x8x128xf32> to vector<8x128xf32>
    %44 = vector.shape_cast %41 : vector<8x128xf32> to vector<1x1x8x128xf32>
    tpu.vector_store %arg3[%c0_15, %c0_16, %c0_17, %c0_18], %44 {strides = array<i32>} : memref<1x4x8x128xf32, #tpu.memory_space<vmem>>, vector<1x1x8x128xf32>,
    %45 = vector.shape_cast %9 : vector<16x128xf32> to vector<2x8x128xf32>
    %cst_19 = arith.constant dense<0.000000e+00> : vector<8x128xf32>
    %46 = vector.multi_reduction <add>, %45, %cst_19 [0] : vector<2x8x128xf32> to vector<8x128xf32>
    %c0_20 = arith.constant 0 : index
    %c1 = arith.constant 1 : index
    %c0_21 = arith.constant 0 : index
    %c0_22 = arith.constant 0 : index
    %47 = vector.load %arg3[%c0_20, %c1, %c0_21, %c0_22] : memref<1x4x8x128xf32, #tpu.memory_space<vmem>>, vector<1x1x8x128xf32>
    %48 = vector.shape_cast %47 : vector<1x1x8x128xf32> to vector<8x128xf32>
    %49 = vector.shape_cast %46 : vector<8x128xf32> to vector<1x1x8x128xf32>
    tpu.vector_store %arg3[%c0_20, %c1, %c0_21, %c0_22], %49 {strides = array<i32>} : memref<1x4x8x128xf32, #tpu.memory_space<vmem>>, vector<1x1x8x128xf32>,
    %50 = vector.shape_cast %2 : vector<16x128xf32> to vector<2x8x128xf32>
    %cst_23 = arith.constant dense<0.000000e+00> : vector<8x128xf32>
    %51 = vector.multi_reduction <add>, %50, %cst_23 [0] : vector<2x8x128xf32> to vector<8x128xf32>
    %c0_24 = arith.constant 0 : index
    %c2 = arith.constant 2 : index
    %c0_25 = arith.constant 0 : index
    %c0_26 = arith.constant 0 : index
    %52 = vector.load %arg3[%c0_24, %c2, %c0_25, %c0_26] : memref<1x4x8x128xf32, #tpu.memory_space<vmem>>, vector<1x1x8x128xf32>
    %53 = vector.shape_cast %52 : vector<1x1x8x128xf32> to vector<8x128xf32>
    %54 = vector.shape_cast %51 : vector<8x128xf32> to vector<1x1x8x128xf32>
    tpu.vector_store %arg3[%c0_24, %c2, %c0_25, %c0_26], %54 {strides = array<i32>} : memref<1x4x8x128xf32, #tpu.memory_space<vmem>>, vector<1x1x8x128xf32>,
    %55 = vector.shape_cast %38 : vector<16x128xf32> to vector<2x8x128xf32>
    %cst_27 = arith.constant dense<0.000000e+00> : vector<8x128xf32>
    %56 = vector.multi_reduction <add>, %55, %cst_27 [0] : vector<2x8x128xf32> to vector<8x128xf32>
    %c0_28 = arith.constant 0 : index
    %c3 = arith.constant 3 : index
    %c0_29 = arith.constant 0 : index
    %c0_30 = arith.constant 0 : index
    %57 = vector.load %arg3[%c0_28, %c3, %c0_29, %c0_30] : memref<1x4x8x128xf32, #tpu.memory_space<vmem>>, vector<1x1x8x128xf32>
    %58 = vector.shape_cast %57 : vector<1x1x8x128xf32> to vector<8x128xf32>
    %59 = vector.shape_cast %56 : vector<8x128xf32> to vector<1x1x8x128xf32>
    tpu.vector_store %arg3[%c0_28, %c3, %c0_29, %c0_30], %59 {strides = array<i32>} : memref<1x4x8x128xf32, #tpu.memory_space<vmem>>, vector<1x1x8x128xf32>,
    return
  }
  func.func @transform_0(%arg0: i32) -> (i32, i32) {
    %c0_i32 = arith.constant 0 : i32
    %c0_i32_0 = arith.constant 0 : i32
    return %arg0, %c0_i32 : i32, i32
  }
  func.func @transform_1(%arg0: i32) -> (i32, i32) {
    %c0_i32 = arith.constant 0 : i32
    %c0_i32_0 = arith.constant 0 : i32
    return %arg0, %c0_i32 : i32, i32
  }
  func.func @transform_2(%arg0: i32) -> (i32, i32, i32, i32) {
    %c0_i32 = arith.constant 0 : i32
    %c0_i32_0 = arith.constant 0 : i32
    %c0_i32_1 = arith.constant 0 : i32
    %c0_i32_2 = arith.constant 0 : i32
    return %arg0, %c0_i32, %c0_i32_0, %c0_i32_1 : i32, i32, i32, i32
  }
}

</mosaic_0001>

<bundles_post_ra>
// kernel: tpu_custom_call.1
= control target key start
LH: loop header
LB: loop body
LE: loop exit
PB: predicated region body
PF: predicated region fallthrough
CT: control target
= control target key end

     0   :  { %7 = vsyncpa [#allocation3], 0  ;;  %s310_s0 = inlined_call_operand.hbm [shape: f32[16,128], index: 0, kind: input, shape index: {}]   ;;  %s311_s1 = inlined_call_operand.hbm [shape: bf16[16,128], index: 1, kind: input, shape index: {}]   ;;  %s312_s2 = inlined_call_operand.hbm [shape: f32[1,4,8,128], index: 2, kind: output, shape index: {}]  }
   0x1   :  { %8 = vsyncpa [#allocation6], 0 }
   0x2   :  { %9 = vsyncpa [#allocation4], 0  ;;  %s230_s9 = smov [#allocation2]   ;;  %s158_s13 = scalar_lea.hbm %s310_s0, 256 }
   0x3   :  { %s15_s10 = sshll.u32 %s230_s9, 4  ;;  %p159_p0 = scmp.ne.s32.totalorder %s310_s0, %s158_s13  ;;  %s16_s10 = int_to_ptr.vmem [resolvable:$true] %s15_s10 }
   0x4   :  { %p162_p1 = scmp.lt.u32.totalorder %s158_s13, %s310_s0 }
   0x6   :  { %p164_p2 = pnand %p162_p1, %p159_p0 }
   0x8   :  { %167 = shalt.err (!%p164_p2)
}
   0x9   :  { %s168_s18 = scalar_lea.vmem %s16_s10, 256  ;;  %p173_p4 = scmp.lt.s32.totalorder %s16_s10, %s16_s10 }
   0xa   :  { %p169_p3 = scmp.ne.s32.totalorder %s16_s10, %s168_s18  ;;  %p174_p5 = scmp.lt.s32.totalorder %s168_s18, %s168_s18 }
   0xc   :  { %p175_p6 = por %p174_p5, %p173_p4 }
   0xe   :  { %p176_p7 = pnand %p175_p6, %p169_p3 }
  0x10   :  { %179 = shalt.err (!%p176_p7)
}
  0x11   :  { %s231_s19 = smov 128   ;;  %s232_s20 = smov 8  }
  0x12   :  { %21 = dma.hbm_to_vmem [thread:$0]  %s310_s0, 256, %s16_s10, [#allocation3], %s231_s19, %s231_s19, %s232_s20  }
  0x13   :  { %s233_s23 = smov [#allocation5]   ;;  %s180_s27 = scalar_lea.hbm %s311_s1, 128 }
  0x14   :  { %s27_s24 = sshll.u32 %s233_s23, 4  ;;  %p181_p8 = scmp.ne.s32.totalorder %s311_s1, %s180_s27  ;;  %s28_s24 = int_to_ptr.vmem [resolvable:$true] %s27_s24 }
  0x15   :  { %p184_p9 = scmp.lt.u32.totalorder %s180_s27, %s311_s1 }
  0x17   :  { %p186_p10 = pnand %p184_p9, %p181_p8 }
  0x19   :  { %189 = shalt.err (!%p186_p10)
}
  0x1a   :  { %s190_s4 = scalar_lea.vmem %s28_s24, 128  ;;  %p195_p12 = scmp.lt.s32.totalorder %s28_s24, %s28_s24 }
  0x1b   :  { %p191_p11 = scmp.ne.s32.totalorder %s28_s24, %s190_s4  ;;  %p196_p13 = scmp.lt.s32.totalorder %s190_s4, %s190_s4 }
  0x1d   :  { %p197_p0 = por %p196_p13, %p195_p12 }
  0x1f   :  { %p198_p1 = pnand %p197_p0, %p191_p11 }
  0x21   :  { %201 = shalt.err (!%p198_p1)
}
  0x22   :  { %s234_s0 = smov 64   ;;  %s235_s5 = smov 4  }
  0x23   :  { %33 = dma.hbm_to_vmem [thread:$0]  %s311_s1, 128, %s28_s24, [#allocation6], %s234_s0, %s234_s0, %s235_s5  }
  0x24   :  { %224 = dma.done.wait [#allocation3], 256  }
  0x25   :  { %225 = vsyncadd [#allocation3], 4294967040 }
  0x26   :  { %226 = dma.done.wait [#allocation6], 128  }
  0x27   :  { %227 = vsyncadd [#allocation6], 4294967168  ;;  %v279_v0 = vld [vmem:[#allocation2] sm:$0xff]  ;;  %v281_v1 = vld [vmem:[#allocation2 + $0x8] sm:$0xff]  ;;  %s236_s1 = smov [#allocation7]  }
  0x28   :  { %v132_v2 = vld [vmem:[#allocation5] sm:$0xff]   ;;  %v46_v5 = vmul.f32 0.5, %v279_v0  ;;  %v47_v6 = vmul.f32 0.5, %v281_v1  ;;  %v58_v7 = vand.u32 2147483647, %v279_v0  ;;  %v54_v38 = vsub.f32 0.0, %v279_v0 }
  0x29   :  { %v133_v3 = vunpack.c.l.bf16 %v132_v2  ;;  %v134_v4 = vunpack.c.h.bf16 %v132_v2  ;;  %v59_v8 = vand.u32 2147483647, %v281_v1  ;;  %v55_v40 = vsub.f32 0.0, %v281_v1  ;;  %s116_s8 = sshll.u32 %s236_s1, 4  ;;  %s117_s8 = int_to_ptr.vmem [resolvable:$true] %s116_s8 }
  0x2a   :  { %142 = vtanh.f32 %v46_v5  ;;  %v60_v10 = vsub.f32 0.0, %v58_v7  ;;  %v56_v44 = vmax.f32 %v54_v38, 0.0  ;;  %s202_s9 = scalar_lea.vmem %s117_s8, 512  ;;  %p207_p3 = scmp.lt.s32.totalorder %s117_s8, %s117_s8 }
  0x2b   :  { %v105_v9 = vadd.f32 %v134_v4, %v133_v3  ;;  %144 = vtanh.f32 %v47_v6  ;;  %v61_v11 = vsub.f32 0.0, %v59_v8  ;;  %v80_v12 = vmul.f32 2.0, %v133_v3  ;;  %p203_p2 = scmp.ne.s32.totalorder %s117_s8, %s202_s9  ;;  %p208_p4 = scmp.lt.s32.totalorder %s202_s9, %s202_s9 }
  0x2c   :  { %v62_v13 = vmul.f32 1.442695, %v60_v10  ;;  %v81_v14 = vmul.f32 2.0, %v134_v4  ;;  %v74_v42 = vmul.f32 %v133_v3, %v279_v0  ;;  %v75_v43 = vmul.f32 %v134_v4, %v281_v1 }
  0x2d   :  { %107 = vst [vmem:[#allocation7 + $0x10] sm:$0xff] %v105_v9  ;;  %v64_v15 = vmul.f32 1.442695, %v61_v11  ;;  %v129_v16 = vadd.f32 -1.0, %v80_v12  ;;  %v57_v47 = vmax.f32 %v55_v40, 0.0  ;;  %p209_p5 = por %p208_p4, %p207_p3 }
  0x2e   :  { %146 = vpow2.f32 %v62_v13  ;;  %v130_v17 = vadd.f32 -1.0, %v81_v14  ;;  %v76_v51 = vsub.f32 %v279_v0, %v74_v42  ;;  %v77_v53 = vsub.f32 %v281_v1, %v75_v43 }
  0x2f   :  { %148 = vpow2.f32 %v64_v15  ;;  %v84_v18 = vmul.f32 %v129_v16, %v279_v0  ;;  %p210_p6 = pnand %p209_p5, %p203_p2 }
  0x30   :  { %v85_v19 = vmul.f32 %v130_v17, %v281_v1 }
  0x31   :  { %v86_v20 = vmul.f32 0.5, %v84_v18 }
  0x32   :  { %v87_v21 = vmul.f32 0.5, %v85_v19 }
  0x33   :  { %150 = vtanh.f32 %v86_v20 }
  0x34   :  { %v143_v22 = vpop.eup %142  ;;  %152 = vtanh.f32 %v87_v21 }
  0x35   :  { %v145_v23 = vpop.eup %144  ;;  %v50_v24 = vadd.f32 1.0, %v143_v22 }
  0x36   :  { %v51_v25 = vadd.f32 1.0, %v145_v23 }
  0x37   :  { %v52_v26 = vmul.f32 0.5, %v50_v24 }
  0x38   :  { %v53_v27 = vmul.f32 0.5, %v51_v25  ;;  %v147_v28 = vpop.eup %146 }
  0x39   :  { %v98_v29 = vmul.f32 %v133_v3, %v52_v26  ;;  %v149_v30 = vpop.eup %148  ;;  %v66_v33 = vadd.f32 1.0, %v147_v28 }
  0x3a   :  { %v99_v31 = vmul.f32 %v134_v4, %v53_v27  ;;  %v102_v32 = vadd.f32 %v53_v27, %v52_v26  ;;  %v67_v34 = vadd.f32 1.0, %v149_v30 }
  0x3b   :  { %154 = vlog2.f32 %v66_v33 }
  0x3c   :  { %v100_v35 = vadd.f32 %v99_v31, %v98_v29  ;;  %104 = vst [vmem:[#allocation7 + $0x8] sm:$0xff] %v102_v32  ;;  %156 = vlog2.f32 %v67_v34 }
  0x3d   :  { %v151_v36 = vpop.eup %150 }
  0x3e   :  { %101 = vst [vmem:[#allocation7] sm:$0xff] %v100_v35  ;;  %v153_v37 = vpop.eup %152  ;;  %v90_v39 = vsub.f32 1.0, %v151_v36 }
  0x3f   :  { %v91_v41 = vsub.f32 1.0, %v153_v37 }
  0x40   :  { %v92_v45 = vmul.f32 0.5, %v90_v39 }
  0x41   :  { %v93_v48 = vmul.f32 0.5, %v91_v41 }
  0x42   :  { %v94_v55 = vmul.f32 %v92_v45, %v92_v45 }
  0x43   :  { %v95_v57 = vmul.f32 %v93_v48, %v93_v48 }
  0x45   :  { %v155_v46 = vpop.eup %154 }
  0x46   :  { %v157_v49 = vpop.eup %156  ;;  %v69_v50 = vmul.f32 0.6931472, %v155_v46 }
  0x47   :  { %v71_v52 = vmul.f32 0.6931472, %v157_v49 }
  0x48   :  { %v72_v54 = vadd.f32 %v69_v50, %v56_v44 }
  0x49   :  { %v73_v56 = vadd.f32 %v71_v52, %v57_v47 }
  0x4a   :  { %v78_v58 = vadd.f32 %v76_v51, %v72_v54 }
  0x4b   :  { %v79_v59 = vadd.f32 %v77_v53, %v73_v56 }
  0x4c   :  { %v96_v60 = vmul.f32 %v94_v55, %v78_v58 }
  0x4d   :  { %v97_v61 = vmul.f32 %v95_v57, %v79_v59 }
  0x4f   :  { %v108_v62 = vadd.f32 %v97_v61, %v96_v60 }
  0x51   :  { %110 = vst [vmem:[#allocation7 + $0x18] sm:$0xff] %v108_v62 }
  0x52   :  { %213 = shalt.err (!%p210_p6)
}
  0x53   :  { %s214_s12 = scalar_lea.hbm %s312_s2, 512 }
  0x54   :  { %p215_p7 = scmp.ne.s32.totalorder %s312_s2, %s214_s12  ;;  %p218_p8 = scmp.lt.u32.totalorder %s214_s12, %s312_s2 }
  0x56   :  { %p220_p9 = pnand %p218_p8, %p215_p7 }
  0x58   :  { %223 = shalt.err (!%p220_p9)
}
  0x59   :  { %122 = dma.vmem_to_hbm [thread:$0]  %s117_s8, 512, %s312_s2, [#allocation4], %s231_s19, %s231_s19, %s232_s20  }
  0x5a   :  { %228 = dma.done.wait [#allocation4], 512  }
  0x5b   :  { %229 = vsyncadd [#allocation4], 4294966784 }
  0x5c   :  { %126 = vsyncpa [#allocation3], 1 }
  0x5d   :  { %127 = vsyncpa [#allocation6], 1 }
  0x5e   :  { %128 = vsyncpa [#allocation4], 1 }

</bundles_post_ra>
